<compile_context>
chip_gen: v7x
topology: tpu7x:2x2x1
jax: 0.10.0
libtpu: 0.0.40
codegen_flags: <defaults>
</compile_context>

<pallas_src>
import math
import jax
import jax.numpy as jnp
from jax.experimental import pallas as pl
from jax.experimental.pallas import tpu as pltpu


# ----------------------------- Pallas kernel ------------------------------ #
def _safe_log_softmax_kernel(x_ref, o_ref):
    # x_ref / o_ref: (TM, N) -- softmax along the last (lane) axis.
    # finfo of the *input* dtype, per the PyTorch module.
    large = jnp.float32(jnp.finfo(x_ref.dtype).max)

    x = x_ref[...].astype(jnp.float32)
    # ±inf -> ±finfo(in_dtype).max. Finite values of the input dtype never
    # exceed finfo.max, and minimum/maximum propagate NaN, so this matches the
    # two where(x == ±inf, ...) selects of the reference with half the VALU ops.
    x = jnp.minimum(jnp.maximum(x, -large), large)

    m = jnp.max(x, axis=-1, keepdims=True)
    xs = x - m                                    # x_stable (row max == 0)
    lse = jnp.log(jnp.sum(jnp.exp(xs), axis=-1, keepdims=True))
    o_ref[...] = (xs - lse).astype(o_ref.dtype)


# --------------------------- tiling / VMEM policy -------------------------- #
def _vmem_policy():
    """(tile_budget_bytes, vmem_limit_bytes), generation-aware."""
    try:
        vmem_cap = int(pltpu.get_tpu_info().vmem_capacity_bytes)
    except Exception:
        vmem_cap = 128 * 1024 * 1024
    if vmem_cap <= 64 * 1024 * 1024:
        # v7x-like: 64 MiB physical per TensorCore -> leave headroom for the
        # double-buffers, f32 temporaries and compiler scratch/spills.
        return 14 * 1024 * 1024, 48 * 1024 * 1024
    # v5e / v6e: 128 MiB physical VMEM.
    return 24 * 1024 * 1024, 64 * 1024 * 1024


def _choose_tm(M, N, in_itemsize, out_itemsize, tile_budget):
    """Row-tile size: as big as the VMEM tile budget allows (dtype-aware)."""
    # Per-row bytes: double-buffered in+out pipeline tiles in native dtypes,
    # plus an allowance for ~4 live (TM, N) f32 temporaries inside the kernel.
    per_row = 2 * (in_itemsize + out_itemsize) * N + 4 * 4 * N
    cap = max(8, (tile_budget // max(per_row, 1)) // 8 * 8)
    tm = min(2048, cap)
    if M >= 16:
        # Guarantee >= 2 grid steps so the "parallel" M axis can shard across
        # both TensorCores on v7x; negligible overhead on v5e/v6e.
        half = (((M + 1) // 2) + 7) // 8 * 8
        tm = min(tm, half)
    if tm >= M:
        return M                                   # full extent is always legal
    return max(8, (tm // 8) * 8)                   # TM < M must be 8-aligned


def _safe_log_softmax_2d(x2d):
    """Row-wise safe log-softmax on a (M, N) array, softmax along axis -1."""
    M, N = x2d.shape
    itemsize = jnp.dtype(x2d.dtype).itemsize

    tile_budget, vmem_limit = _vmem_policy()
    TM = _choose_tm(M, N, itemsize, itemsize, tile_budget)
    grid = (pl.cdiv(M, TM),)

    return pl.pallas_call(
        _safe_log_softmax_kernel,
        out_shape=jax.ShapeDtypeStruct((M, N), x2d.dtype),
        grid_spec=pltpu.PrefetchScalarGridSpec(
            num_scalar_prefetch=0,
            grid=grid,
            in_specs=[pl.BlockSpec((TM, N), lambda i: (i, 0))],
            out_specs=pl.BlockSpec((TM, N), lambda i: (i, 0)),
        ),
        compiler_params=pltpu.CompilerParams(
            dimension_semantics=("parallel",),      # rows are independent
            vmem_limit_bytes=vmem_limit,
        ),
        cost_estimate=pl.CostEstimate(
            flops=6 * M * N,                        # clamp(2) + max + 2*sub + add
            transcendentals=M * N,                  # exp per element (log is per-row)
            bytes_accessed=2 * M * N * itemsize,
        ),
    )(x2d)


# ---------------------------- Module wrapper ------------------------------ #
class SafeLogSoftmax:
    """JAX/Pallas equivalent of the PyTorch SafeLogSoftmax module."""

    def __init__(self, dim=-1):
        self.dim = dim

    def __call__(self, x):
        ndim = x.ndim
        dim = self.dim % ndim
        # Move the softmax axis to the last (lane) dimension so the per-row
        # reduction is lane-dense and exact inside one block.
        if dim != ndim - 1:
            x = jnp.moveaxis(x, dim, -1)
        shape = x.shape
        N = shape[-1]
        M = int(math.prod(shape[:-1])) if len(shape) > 1 else 1

        out = _safe_log_softmax_2d(x.reshape(M, N))
        out = out.reshape(shape)
        if dim != ndim - 1:
            out = jnp.moveaxis(out, -1, dim)
        return out


# ------------------------------ reference --------------------------------- #
def _ref_safe_log_softmax(x, dim=-1):
    large = jnp.asarray(jnp.finfo(x.dtype).max, x.dtype)
    xr = jnp.where(x == jnp.inf, large, x)
    xr = jnp.where(x == -jnp.inf, -large, xr)
    xs = xr - jnp.max(xr, axis=dim, keepdims=True)
    return jax.nn.log_softmax(xs, axis=dim)


# --------------------------------- main ----------------------------------- #
if __name__ == "__main__":
    key = jax.random.PRNGKey(0)
    k1, k2 = jax.random.split(key)

    mod = SafeLogSoftmax(dim=-1)

    # Case 1: small shape from the module spec (B=2, seq=8, hidden=32),
    # with +/-inf entries exercising the "safe" replacement path.
    x_small = jax.random.normal(k1, (2, 8, 32), dtype=jnp.float32)
    x_small = x_small.at[0, 0, 3].set(jnp.inf)
    x_small = x_small.at[1, 5, 7].set(-jnp.inf)
    y_small = jax.block_until_ready(mod(x_small))
    y_small_ref = _ref_safe_log_softmax(x_small, dim=-1)
    assert y_small.shape == x_small.shape
    assert jnp.allclose(y_small, y_small_ref, atol=1e-5, rtol=1e-5)

    # Case 2: larger lane-dense shape (last dim multiple of 128) so the grid
    # really tiles over rows (>= 2 steps -> megacore-shardable).
    x_big = jax.random.normal(k2, (4, 128, 256), dtype=jnp.float32)
    x_big = x_big.at[2, 17, 100].set(jnp.inf)
    x_big = x_big.at[3, 99, 0].set(-jnp.inf)
    y_big = jax.block_until_ready(mod(x_big))
    y_big_ref = _ref_safe_log_softmax(x_big, dim=-1)
    assert y_big.shape == x_big.shape
    assert jnp.allclose(y_big, y_big_ref, atol=1e-5, rtol=1e-5)

    # Case 3: non-last softmax dim (handled by moveaxis around the kernel).
    mod_d1 = SafeLogSoftmax(dim=1)
    y_d1 = jax.block_until_ready(mod_d1(x_small))
    y_d1_ref = _ref_safe_log_softmax(x_small, dim=1)
    assert jnp.allclose(y_d1, y_d1_ref, atol=1e-5, rtol=1e-5)

    # Case 4: NaN propagation must match the reference after the where->clamp
    # rewrite (rows containing NaN become all-NaN in both).
    x_nan = x_small.at[1, 2, 10].set(jnp.nan)
    y_nan = jax.block_until_ready(mod(x_nan))
    y_nan_ref = _ref_safe_log_softmax(x_nan, dim=-1)
    assert jnp.allclose(y_nan, y_nan_ref, atol=1e-5, rtol=1e-5, equal_nan=True)

    print("KERNEL_OK")
</pallas_src>

<mosaic_0001>
module attributes {stable_mosaic.version = 11 : i64} {
  func.func @_safe_log_softmax_kernel(%arg0: i32, %arg1: memref<8x32xf32, #tpu.memory_space<vmem>>, %arg2: memref<8x32xf32, #tpu.memory_space<vmem>>) attributes {dimension_semantics = [#tpu.dimension_semantics<parallel>], iteration_bounds = array<i64: 2>, scalar_prefetch = 0 : i64, scratch_operands = 0 : i64, tpu.core_type = #tpu.core_type<tc>, window_params = [{transform_indices = @transform_0, window_bounds = array<i64: 8, 32>}, {transform_indices = @transform_1, window_bounds = array<i64: 8, 32>}]} {
    %c0 = arith.constant 0 : index
    %c0_0 = arith.constant 0 : index
    %0 = vector.load %arg1[%c0, %c0_0] : memref<8x32xf32, #tpu.memory_space<vmem>>, vector<8x32xf32>
    %cst = arith.constant 0.000000e+00 : f32
    %cst_1 = arith.constant 3.40282347E+38 : f32
    %1 = arith.subf %cst, %cst_1 : f32
    %2 = vector.broadcast %1 : f32 to vector<8x32xf32>
    %3 = arith.maximumf %0, %2 : vector<8x32xf32>
    %cst_2 = arith.constant 3.40282347E+38 : f32
    %4 = vector.broadcast %cst_2 : f32 to vector<8x32xf32>
    %5 = arith.minimumf %3, %4 : vector<8x32xf32>
    %cst_3 = arith.constant dense<0xFF800000> : vector<8xf32>
    %6 = vector.multi_reduction <maximumf>, %5, %cst_3 [1] : vector<8x32xf32> to vector<8xf32>
    %7 = vector.shape_cast %6 : vector<8xf32> to vector<8x1xf32>
    %8 = vector.broadcast %7 : vector<8x1xf32> to vector<8x32xf32>
    %9 = arith.subf %5, %8 : vector<8x32xf32>
    %10 = math.exp %9 : vector<8x32xf32>
    %cst_4 = arith.constant dense<0.000000e+00> : vector<8xf32>
    %11 = vector.multi_reduction <add>, %10, %cst_4 [1] : vector<8x32xf32> to vector<8xf32>
    %12 = vector.shape_cast %11 : vector<8xf32> to vector<8x1xf32>
    %13 = math.log %12 : vector<8x1xf32>
    %14 = vector.broadcast %13 : vector<8x1xf32> to vector<8x32xf32>
    %15 = arith.subf %9, %14 : vector<8x32xf32>
    %c0_5 = arith.constant 0 : index
    %c0_6 = arith.constant 0 : index
    %16 = vector.load %arg2[%c0_5, %c0_6] : memref<8x32xf32, #tpu.memory_space<vmem>>, vector<8x32xf32>
    tpu.vector_store %arg2[%c0_5, %c0_6], %15 {strides = array<i32>} : memref<8x32xf32, #tpu.memory_space<vmem>>, vector<8x32xf32>,
    return
  }
  func.func @transform_0(%arg0: i32) -> (i32, i32) {
    %c0_i32 = arith.constant 0 : i32
    %c0_i32_0 = arith.constant 0 : i32
    return %arg0, %c0_i32 : i32, i32
  }
  func.func @transform_1(%arg0: i32) -> (i32, i32) {
    %c0_i32 = arith.constant 0 : i32
    %c0_i32_0 = arith.constant 0 : i32
    return %arg0, %c0_i32 : i32, i32
  }
}

</mosaic_0001>

<bundles_post_ra>
// kernel: tpu_custom_call.1
= control target key start
LH: loop header
LB: loop body
LE: loop exit
PB: predicated region body
PF: predicated region fallthrough
CT: control target
= control target key end

     0   :  { %6 = vsyncpa [#allocation3], 0  ;;  %s570_s0 = inlined_call_operand.hbm [shape: f32[16,32], index: 0, kind: input, shape index: {}]   ;;  %s571_s1 = inlined_call_operand.hbm [shape: f32[16,32], index: 1, kind: output, shape index: {}]  }
   0x1   :  { %8 = vsyncpa [#allocation3 + $0x1], 0 }
   0x2   :  { %9 = vsyncpa [#allocation4], 0 }
   0x3   :  { %11 = vsyncpa [#allocation4 + $0x1], 0  ;;  %s406_s6 = smov 0   ;;  %s408_s7 = smov 0  }
   0x4   :  { %s410_s8 = smov 0   ;;  %s412_s9 = smov 0  }
   0x5 LB: > { %s427_s10 = sadd.s32 4294967295, %s392_s9   ;;  %s233_s11 = sadd.s32 4294967294, %s392_s9   ;;  %s392_s9 = sphi %s412_s9, %s586_s9   ;;  %s388_s8 = sphi %s410_s8, %s585_s8   ;;  %s384_s7 = sphi %s408_s7, %s584_s7   ;;  %s380_s6 = sphi %s406_s6, %s583_s6  }
   0x6   : > { %s431_s12 = sadd.s32 1, %s392_s9   ;;  %s24_s13 = sadd.s32 1, %s388_s8 }
   0x7   : > { %s21_s14 = ssub.s32 %s392_s9, %s431_s12  ;;  %p31_p0 = scmp.ne.s32.totalorder %s388_s8, %s384_s7 }
   0x8   : > { %p22_p1 = scmp.eq.s32.totalorder %s21_s14, 0  ;;  %p32_p2 = scmp.eq.s32.totalorder %s392_s9, 0 }
   0x9   : > { %p37_p3 = scmp.ne.s32.totalorder %s384_s7, %s380_s6  ;;  %p38_p4 = scmp.eq.s32.totalorder %s427_s10, 0 }
   0xa   : > { %s443_s15 = scalar_select %p22_p1, %s388_s8, %s24_s13  }
   0xb   : > { %p445_p5 = por %p32_p2, %p31_p0  ;;  %p449_p6 = por %p38_p4, %p37_p3 }
   0xc   : > { %p61_p7 = scmp.eq.s32.totalorder %s427_s10, 1  ;;  %p67_p8 = scmp.eq.s32.totalorder %s233_s11, 1 }
   0xd   : > { %p258_p10 = scmp.lt.s32.totalorder %s392_s9, 2  ;;  %s87_s20 = sand.u32 1, %s388_s8  }
   0xe   : > { %p456_p11 = por %p61_p7, %p31_p0  ;;  %p460_p12 = por %p67_p8, %p37_p3 }
   0xf   : > { %s237_s21 = sshll.u32 %s392_s9, 7  ;;  %s236_s22 = sshll.u32 %s87_s20, 3 }
  0x10   : > { %s575_s18 = scalar_select %p456_p11, 1, 0 }
  0x11   : > { %s576_s19 = scalar_select %p460_p12, 1, 0 }
  0x12   : > { %s469_s25 = scalar_lea.hbm %s570_s0, %s237_s21  ;;  %s91_s26 = scalar_lea.vmem [#allocation2], %s236_s22 }
  0x13   : > { %s98_s27 = sshll.u32 %s91_s26, 4  ;;  %p473_p13 = pnand %p258_p10, %p445_p5  ;;  %s477_s27 = int_to_ptr.vmem [resolvable:$true] %s98_s27 }
  0x14   : > { %s88_s29 = scalar_lea.sflag [#allocation3], %s87_s20  ;;  %s296_s30 = scalar_lea.hbm %s469_s25, 128 }
  0x15   : > { %p297_p2 = scmp.ne.s32.totalorder %s469_s25, %s296_s30  ;;  %p298_p3 = pneg %p473_p13 }
  0x16   : > { %s301_s4 = scalar_lea.hbm %s570_s0, 256  ;;  %p302_p5 = scmp.lt.u32.totalorder %s469_s25, %s570_s0 }
  0x17   : > { %p299_p4 = pnand %p298_p3, %p297_p2  ;;  %p303_p8 = scmp.lt.u32.totalorder %s301_s4, %s296_s30 }
  0x18   : > { %p305_p9 = scmp.lt.u32.totalorder %s296_s30, %s469_s25 }
  0x19   : > { %p300_p7 = pneg %p299_p4  ;;  %p304_p10 = por %p303_p8, %p302_p5 }
  0x1b   : > { %p306_p0 = por %p305_p9, %p304_p10 }
  0x1d   : > { %p307_p1 = pnand %p306_p0, %p300_p7 }
  0x1f   : > { %310 = shalt.err (!%p307_p1)
}
  0x20   : > { %s311_s13 = scalar_lea.vmem %s477_s27, 128  ;;  %s394_s14 = smov [#allocation2]  }
  0x21   : > { %p312_p2 = scmp.ne.s32.totalorder %s477_s27, %s311_s13  ;;  %s316_s16 = sshll.u32 %s394_s14, 4  ;;  %s317_s16 = int_to_ptr.vmem [resolvable:$false] %s316_s16 }
  0x22   : > { %s318_s20 = scalar_lea.vmem %s317_s16, 256  ;;  %p319_p11 = scmp.lt.s32.totalorder %s477_s27, %s317_s16 }
  0x23   : > { %p314_p4 = pnand %p312_p2, %p298_p3  ;;  %p320_p5 = scmp.lt.s32.totalorder %s318_s20, %s311_s13 }
  0x25   : > { %p315_p12 = pneg %p314_p4  ;;  %p321_p8 = por %p320_p5, %p319_p11 }
  0x27   : > { %p322_p9 = pnand %p321_p8, %p315_p12 }
  0x29   : > { %325 = shalt.err (!%p322_p9)
}
  0x2a   : > { %253 = dma.hbm_to_vmem [thread:$0]  (!%p473_p13), %s469_s25, 128, %s477_s27, %s88_s29  }
  0x2b   : > { %p578_p0 = scmp.lt.s32.totalorder %s392_s9, 3  ;;  %p579_p1 = scmp.ge.s32.totalorder %s392_s9, 1 }
  0x2d   : > { %p104_p3 = pnand %p579_p1, %p578_p0 }
  0x2e   : > { %s511_s21 = sand.u32 (!%p104_p3), 1, %s384_s7  }
  0x2f   : > { %107 = sbr.rel (%p104_p3) target bundleno = 388 (0x184), region = 24  ;;  %s239_s22 = sshll.u32 (!%p104_p3), %s511_s21, 3 }
  0x30   : > { %s110_s23 = scalar_lea.sflag (!%p104_p3), [#allocation3], %s511_s21  ;;  %s113_s24 = scalar_lea.vmem (!%p104_p3), [#allocation2], %s239_s22 }
  0x36   : > { %371 = dma.done.wait (%p449_p6), %s110_s23, 128  }
  0x37   : > { %373 = vsyncadd (%p449_p6), %s110_s23, 4294967168  ;;  %v132_v0 = vld [vmem:[%s113_s24] sm:$0xff]  ;;  %vm135_vm0 = vcmask 261120   ;;  %s243_s17 = sshll.u32 %s427_s10, 7  ;;  %s131_s25 = scalar_lea.vmem [#allocation5], %s239_s22 }
  0x38   : > { %v241_v1 = vclamps-f32 %v132_v0, 3.4028235e+38  ;;  %s163_s26 = sshll.u32 %s131_s25, 4  ;;  %s525_s29 = scalar_lea.hbm %s571_s1, %s243_s17  ;;  %s527_s26 = int_to_ptr.vmem [resolvable:$true] %s163_s26 }
  0x39   : > { %s150_s30 = scalar_lea.sflag [#allocation4], %s511_s21  ;;  %s326_s2 = scalar_lea.vmem %s527_s26, 128 }
  0x3a   : > { %v136_v2 = vsel %vm135_vm0, %v241_v1, -inf  ;;  %p327_p6 = scmp.ne.s32.totalorder %s527_s26, %s326_s2  ;;  %p580_p11 = scmp.ne.s32.totalorder %s575_s18, 0 }
  0x3b   : > { %137 = vmax.xlane.f32.xlu0 %v136_v2  ;;  %s395_s10 = smov [#allocation5]  }
  0x3c   : > { %p328_p12 = pnand %p327_p6, %p580_p11  ;;  %s330_s3 = sshll.u32 %s395_s10, 4  ;;  %s331_s3 = int_to_ptr.vmem [resolvable:$false] %s330_s3 }
  0x3d   : > { %s332_s4 = scalar_lea.vmem %s331_s3, 256  ;;  %p333_p7 = scmp.lt.s32.totalorder %s527_s26, %s331_s3 }
  0x3e   : > { %p329_p13 = pneg %p328_p12  ;;  %p334_p10 = scmp.lt.s32.totalorder %s332_s4, %s326_s2 }
  0x40   : > { %p335_p2 = por %p334_p10, %p333_p7 }
  0x42   : > { %p336_p4 = pnand %p335_p2, %p329_p13 }
  0xc8   : > { %v138_v3 = vpop.xlane.xlu0 %137 }
  0xc9   : > { %v139_v4 = vsub.f32 %v241_v1, %v138_v3 }
  0xcb   : > { %v140_v5 = vmul.f32 1.442695, %v139_v4 }
  0xcd   : > { %292 = vpow2.f32 %v140_v5 }
  0xd7   : > { %v293_v6 = vpop.eup %292 }
  0xd8   : > { %v142_v7 = vsel %vm135_vm0, %v293_v6, 0.0 }
  0xd9   : > { %143 = vadd.xlane.f32.xlu0 %v142_v7 }
 0x166   : > { %v144_v8 = vpop.xlane.xlu0 %143 }
 0x167   : > { %294 = vlog2.f32 %v144_v8 }
 0x171   : > { %v295_v9 = vpop.eup %294 }
 0x172   : > { %v146_v10 = vmul.f32 0.6931472, %v295_v9 }
 0x174   : > { %v147_v11 = vsub.f32 %v139_v4, %v146_v10 }
 0x176   : > { %148 = vst.msk [vmem:[%s131_s25] sm:$0xff] %vm135_vm0, %v147_v11 }
 0x177   : > { %339 = shalt.err (!%p336_p4)
}
 0x178   : > { %s340_s5 = scalar_lea.hbm %s525_s29, 128  ;;  %s344_s14 = scalar_lea.hbm %s571_s1, 256 }
 0x179   : > { %p341_p5 = scmp.ne.s32.totalorder %s525_s29, %s340_s5  ;;  %p345_p0 = scmp.lt.u32.totalorder %s525_s29, %s571_s1 }
 0x17a   : > { %p346_p1 = scmp.lt.u32.totalorder %s344_s14, %s340_s5  ;;  %p348_p6 = scmp.lt.u32.totalorder %s340_s5, %s525_s29 }
 0x17b   : > { %p342_p8 = pnand %p341_p5, %p580_p11 }
 0x17c   : > { %p347_p3 = por %p346_p1, %p345_p0 }
 0x17d   : > { %p343_p9 = pneg %p342_p8 }
 0x17e   : > { %p349_p12 = por %p348_p6, %p347_p3 }
 0x180   : > { %p350_p13 = pnand %p349_p12, %p343_p9 }
 0x182   : > { %353 = shalt.err (!%p350_p13)
}
 0x183   : > { %248 = dma.vmem_to_hbm [thread:$0]  (%p580_p11), %s527_s26, 128, %s525_s29, %s150_s30  }
 0x184 PF: > { %s175_s21 = sand.u32 1, %s380_s6   ;;  %p581_p7 = scmp.ne.s32.totalorder %s576_s19, 0 }
 0x185   : > { %p582_p10 = scmp.ge.s32.totalorder %s392_s9, 2  ;;  %s176_s22 = scalar_lea.sflag [#allocation4], %s175_s21 }
 0x187   : > { %p255_p2 = pnand %p582_p10, %p581_p7 }
 0x189   : > { %375 = dma.done.wait (!%p255_p2), %s176_s22, 128  }
 0x18a   : > { %377 = vsyncadd (!%p255_p2), %s176_s22, 4294967168  ;;  %p14_p4 = scmp.ge.s32.totalorder %s431_s12, 4   ;;  %s583_s6 = smov %s384_s7 }
 0x18b   : > { %s584_s7 = smov %s388_s8  ;;  %s585_s8 = smov %s443_s15 }
 0x18c   : > { %s586_s9 = smov %s431_s12  ;;  %16 = sbr.rel (!%p14_p4) target bundleno = 5 (0x5), region = 69 }
 0x193   :  { %181 = vsyncpa [#allocation3], 1 }
 0x194   :  { %183 = vsyncpa [#allocation3 + $0x1], 1 }
 0x195   :  { %184 = vsyncpa [#allocation4], 1 }
 0x196   :  { %186 = vsyncpa [#allocation4 + $0x1], 1 }

</bundles_post_ra>
